<compile_context>
chip_gen: v7x
topology: tpu7x:2x2x1
jax: 0.10.0
libtpu: 0.0.40
codegen_flags: <defaults>
</compile_context>

<pallas_src>
import functools

import jax
import jax.numpy as jnp
from jax import lax
from jax.experimental import pallas as pl
from jax.experimental.pallas import tpu as pltpu

EPS = 1e-7        # BetaBernoulliLoss epsilon (clamp min for alpha/beta)
CLAMP_MIN = 1e-6  # clamp_min on the P/U weight sums
LANE = 128
SUB = 8
MAX_BLOCK_ROWS = 2048   # (2048,128) f32 = 1 MiB/input; x4 inputs x2 bufs = 8 MiB
CHUNK_ROWS = 256        # inner-loop chunk; bounds temporaries to ~128 KiB each


def _cdiv(a, b):
    return -(-a // b)


def _round_up(a, m):
    return _cdiv(a, m) * m


def _num_tensorcores():
    """2-way 'parallel' core split only pays off on 2-TensorCore chips (v7x)."""
    try:
        kind = jax.devices()[0].device_kind.lower()
    except Exception:
        return 1
    return 2 if "7" in kind else 1


def _approx_div(num, den):
    """num/den via EUP approx reciprocal + one Newton step (~1e-7 rel. err)."""
    r = pl.reciprocal(den, approx=True)
    r = r * (2.0 - den * r)
    return num * r


def _digamma(x):
    """Elementwise digamma for x > 0 (shift-by-6 rational + asymptotic tail).

    digamma(x) = log(x+6) - [Q'(x)(x+6) + Q(x)/2]/[Q(x)(x+6)] - tail(1/(x+6))
    with Q(x) = x(x+1)...(x+5).  The rational divide uses one approx reciprocal
    refined by a single Newton step; the small O(1/z^2) tail uses a plain
    approx (EUP) reciprocal.
    """
    z = x + 6.0
    # Q(x)  = x^6 + 15x^5 + 85x^4 + 225x^3 + 274x^2 + 120x
    # Q'(x) = 6x^5 + 75x^4 + 340x^3 + 675x^2 + 548x + 120
    q = (((((x + 15.0) * x + 85.0) * x + 225.0) * x + 274.0) * x + 120.0) * x
    qp = ((((6.0 * x + 75.0) * x + 340.0) * x + 675.0) * x + 548.0) * x + 120.0
    rat = _approx_div(qp * z + 0.5 * q, q * z)   # sum_k 1/(x+k) + 0.5/(x+6)
    inv = pl.reciprocal(z, approx=True)
    inv2 = inv * inv
    tail = inv2 * (1.0 / 12.0 - inv2 * (1.0 / 120.0 - inv2 * (1.0 / 252.0)))
    return jnp.log(z) - rat - tail


def _chunk_partials(a, b, lab, w):
    """Partial sums of one (rows,128) chunk, folded to five (8,128) vregs."""
    a = jnp.maximum(a, EPS)
    b = jnp.maximum(b, EPS)
    dg_ab = _digamma(a + b)
    term1 = _digamma(a) - dg_ab      # E[log p]      (label == 1 branch)
    term2 = _digamma(b) - dg_ab      # E[log (1-p)]  (label == 0 branch)

    # Multiply-based masking: labels are assumed strictly {0,1}; padded /
    # out-of-range rows always arrive with w == 0 and lab == 0.
    wp = w * lab
    wu = w - wp

    rows = a.shape[0]

    def fold(x):
        # (rows,128) -> (8,128): tile-aligned reshape + VALU vreg adds.
        return jnp.sum(x.reshape(rows // SUB, SUB, LANE), axis=0)

    return (fold(wp),            # sum w       over P
            fold(wu),            # sum w       over U
            fold(term1 * wp),    # sum t1 * w  over P
            fold(term2 * wp),    # sum t2 * w  over P
            fold(term2 * wu))    # sum t2 * w  over U


def _pu_kernel(steps, block_rows, valid_rows, ragged,
               a_ref, b_ref, l_ref, w_ref, out_ref):
    c = pl.program_id(0)   # core / parallel split
    i = pl.program_id(1)   # reduction step within this core's range

    @pl.when(i == 0)
    def _init():
        out_ref[...] = jnp.zeros_like(out_ref)

    blk = c * steps + i            # intended (unclamped) block index
    row0 = blk * block_rows        # first global row of this block

    def add_chunk(sums, r0, rows):
        idx = (pl.ds(r0, rows), slice(None))
        a, b, lab, w = a_ref[idx], b_ref[idx], l_ref[idx], w_ref[idx]
        if ragged:
            # Only tail chunk(s) can overlap the out-of-range region (whose
            # contents may be garbage / NaN); gate the mask there so all clean
            # chunks pay nothing.
            def masked(a, b, lab, w):
                r = row0 + r0 + lax.broadcasted_iota(jnp.int32, (rows, LANE), 0)
                ok = r < valid_rows
                return (jnp.where(ok, a, 1.0), jnp.where(ok, b, 1.0),
                        jnp.where(ok, lab, 0.0), jnp.where(ok, w, 0.0))

            a, b, lab, w = lax.cond(
                row0 + r0 + rows > valid_rows,
                masked,
                lambda a, b, lab, w: (a, b, lab, w),
                a, b, lab, w)
        p = _chunk_partials(a, b, lab, w)
        return tuple(s + q for s, q in zip(sums, p))

    chunk = min(CHUNK_ROWS, block_rows)
    n_full = block_rows // chunk
    rem = block_rows - n_full * chunk        # static, multiple of 8

    sums = tuple(jnp.zeros((SUB, LANE), jnp.float32) for _ in range(5))
    if n_full == 1:
        sums = add_chunk(sums, 0, chunk)
    else:
        sums = lax.fori_loop(
            0, n_full,
            lambda j, s: add_chunk(s, pl.multiple_of(j * chunk, chunk), chunk),
            sums)
    if rem:
        sums = add_chunk(sums, n_full * chunk, rem)

    for k in range(5):
        out_ref[k * SUB:(k + 1) * SUB, :] += sums[k]


def balanced_pu_loss(alpha, beta, labels, weighting=None, *, pi_real):
    assert 0.0 < pi_real < 1.0
    if weighting is None:
        weighting = jnp.ones(labels.shape, dtype=jnp.float32)

    a = alpha.reshape(-1).astype(jnp.float32)
    b = beta.reshape(-1).astype(jnp.float32)
    l = labels.reshape(-1).astype(jnp.float32)
    w = weighting.reshape(-1).astype(jnp.float32)

    n = a.shape[0]
    tile = SUB * LANE
    if n % tile != 0:
        # Rare slow path: single neutral pad to an (R,128), R % 8 == 0 layout.
        n_pad = _round_up(n, tile)
        pad = n_pad - n
        a = jnp.pad(a, (0, pad), constant_values=1.0)
        b = jnp.pad(b, (0, pad), constant_values=1.0)
        l = jnp.pad(l, (0, pad), constant_values=0.0)
        w = jnp.pad(w, (0, pad), constant_values=0.0)
        n = n_pad

    R = n // LANE                              # multiple of 8
    a2, b2, l2, w2 = (x.reshape(R, LANE) for x in (a, b, l, w))

    # Grid / block sizing: cover R with ncores*steps blocks whose size is the
    # smallest multiple of 8 rows that reaches R, so the overhang (dead, masked
    # work) is at most a few rows per block instead of up to a whole block.
    ncores = _num_tensorcores()
    steps = max(1, _cdiv(R, ncores * MAX_BLOCK_ROWS))
    block_rows = _round_up(_cdiv(R, ncores * steps), SUB)
    data_blocks = _cdiv(R, block_rows)
    ragged = (ncores * steps * block_rows) != R

    def in_map(c, i):
        # Clamp so any overhang block stays in range; in-kernel masking (using
        # the unclamped intended index) zeroes its contribution.
        return (jnp.minimum(c * steps + i, data_blocks - 1), 0)

    in_spec = pl.BlockSpec((block_rows, LANE), in_map)
    out_spec = pl.BlockSpec((5 * SUB, LANE), lambda c, i: (c, 0))

    partials = pl.pallas_call(
        functools.partial(_pu_kernel, steps, block_rows, R, ragged),
        out_shape=jax.ShapeDtypeStruct((ncores * 5 * SUB, LANE), jnp.float32),
        grid_spec=pltpu.PrefetchScalarGridSpec(
            num_scalar_prefetch=0,
            grid=(ncores, steps),
            in_specs=[in_spec, in_spec, in_spec, in_spec],
            out_specs=out_spec,
        ),
        compiler_params=pltpu.CompilerParams(
            dimension_semantics=("parallel", "arbitrary")),
    )(a2, b2, l2, w2)

    # Tiny final reduction + nonlinear balanced-PU combine in plain JAX
    # (keeps pi_real out of the kernel -> no recompile when it changes).
    sums = jnp.sum(partials.reshape(ncores, 5, SUB, LANE), axis=(0, 2, 3))
    sum_wp, sum_wu, s_t1p, s_t2p, s_t2u = (sums[k] for k in range(5))

    # torch's per-sample renormalization (w * numel / sum(w)) cancels with the
    # subsequent .mean(); the means reduce exactly to
    # weighted-sum / clamp_min(weight-sum, 1e-6).
    denom_p = jnp.maximum(sum_wp, CLAMP_MIN)
    denom_u = jnp.maximum(sum_wu, CLAMP_MIN)
    r_p_pos = -s_t1p / denom_p
    r_p_neg = -s_t2p / denom_p
    r_u_neg = -s_t2u / denom_u

    inner = r_u_neg - pi_real * r_p_neg
    c_pos = 0.5
    c_un = 0.5 / (1.0 - pi_real)
    return jnp.where(inner >= 0.0, c_pos * r_p_pos + c_un * inner,
                     c_un * (-inner))


def _reference(alpha, beta, labels, weighting, pi_real):
    """Pure-JAX reference mirroring the torch forward semantics."""
    from jax.scipy.special import digamma
    a = jnp.maximum(alpha.astype(jnp.float32), EPS)
    b = jnp.maximum(beta.astype(jnp.float32), EPS)
    lab = labels.astype(jnp.float32)
    w = weighting.astype(jnp.float32)
    term1 = digamma(a) - digamma(a + b)
    term2 = digamma(b) - digamma(a + b)
    p = (lab == 1.0).astype(jnp.float32)
    u = (lab == 0.0).astype(jnp.float32)
    wp, wu = w * p, w * u
    denom_p = jnp.maximum(jnp.sum(wp), CLAMP_MIN)
    denom_u = jnp.maximum(jnp.sum(wu), CLAMP_MIN)
    r_p_pos = jnp.sum(-term1 * wp) / denom_p
    r_p_neg = jnp.sum(-term2 * wp) / denom_p
    r_u_neg = jnp.sum(-term2 * wu) / denom_u
    inner = r_u_neg - pi_real * r_p_neg
    c_pos, c_un = 0.5, 0.5 / (1.0 - pi_real)
    return jnp.where(inner >= 0.0, c_pos * r_p_pos + c_un * inner,
                     c_un * (-inner))


if __name__ == "__main__":
    pi_real = 0.05

    def make_inputs(key, shape):
        k1, k2, k3, k4 = jax.random.split(key, 4)
        alpha = jax.random.uniform(k1, shape, jnp.float32, 0.5, 3.0)
        beta = jax.random.uniform(k2, shape, jnp.float32, 0.5, 3.0)
        labels = jax.random.bernoulli(k3, 0.3, shape).astype(jnp.float32)
        weighting = jax.random.uniform(k4, shape, jnp.float32, 0.5, 1.5)
        return alpha, beta, labels, weighting

    key = jax.random.PRNGKey(0)
    k_a, k_b, k_c = jax.random.split(key, 3)

    # Primary (module-sized) test: 2048 elements -> (16,128), single block.
    alpha, beta, labels, weighting = make_inputs(k_a, (2, 4, 16, 16))
    risk = balanced_pu_loss(alpha, beta, labels, weighting, pi_real=pi_real)
    risk = jax.block_until_ready(risk)
    ref = _reference(alpha, beta, labels, weighting, pi_real)
    assert jnp.allclose(risk, ref, rtol=1e-3, atol=1e-4), (risk, ref)

    # Secondary: 2056 rows -> multi-step reduction grid, chunked inner loop
    # (full 256-row chunks + an 8-row remainder chunk), an 8-row ragged
    # overhang (tail-gated in-kernel mask), and the 2-way core split on v7x.
    a2, b2, l2, w2 = make_inputs(k_b, (2, 4, 257, 128))
    risk2 = jax.block_until_ready(
        balanced_pu_loss(a2, b2, l2, w2, pi_real=pi_real))
    ref2 = _reference(a2, b2, l2, w2, pi_real)
    assert jnp.allclose(risk2, ref2, rtol=1e-3, atol=1e-4), (risk2, ref2)

    # Tiny non-1024-multiple shape: exercises the host-side neutral pad path
    # and the weighting=None default.
    a3, b3, l3, _ = make_inputs(k_c, (3, 5, 7))
    risk3 = jax.block_until_ready(
        balanced_pu_loss(a3, b3, l3, None, pi_real=pi_real))
    ref3 = _reference(a3, b3, l3, jnp.ones_like(l3), pi_real)
    assert jnp.allclose(risk3, ref3, rtol=1e-3, atol=1e-4), (risk3, ref3)

    print("KERNEL_OK")
</pallas_src>

<mosaic_0001>
module attributes {stable_mosaic.version = 11 : i64} {
  func.func @_pu_kernel(%arg0: i32, %arg1: i32, %arg2: memref<16x128xf32, #tpu.memory_space<vmem>>, %arg3: memref<16x128xf32, #tpu.memory_space<vmem>>, %arg4: memref<16x128xf32, #tpu.memory_space<vmem>>, %arg5: memref<16x128xf32, #tpu.memory_space<vmem>>, %arg6: memref<40x128xf32, #tpu.memory_space<vmem>>) attributes {dimension_semantics = [#tpu.dimension_semantics<parallel>, #tpu.dimension_semantics<arbitrary>], iteration_bounds = array<i64: 1, 1>, scalar_prefetch = 0 : i64, scratch_operands = 0 : i64, tpu.core_type = #tpu.core_type<tc>, window_params = [{transform_indices = @transform_0, window_bounds = array<i64: 16, 128>}, {transform_indices = @transform_1, window_bounds = array<i64: 16, 128>}, {transform_indices = @transform_2, window_bounds = array<i64: 16, 128>}, {transform_indices = @transform_3, window_bounds = array<i64: 16, 128>}, {transform_indices = @transform_4, window_bounds = array<i64: 40, 128>}]} {
    %c0_i32 = arith.constant 0 : i32
    %0 = arith.cmpi eq, %arg1, %c0_i32 : i32
    %1 = arith.extui %0 : i1 to i32
    %c0_i32_0 = arith.constant 0 : i32
    %2 = arith.cmpi ne, %1, %c0_i32_0 : i32
    scf.if %2 {
      %cst_86 = arith.constant 0.000000e+00 : f32
      %225 = vector.broadcast %cst_86 : f32 to vector<40x128xf32>
      %c0_87 = arith.constant 0 : index
      %c0_88 = arith.constant 0 : index
      %226 = vector.load %arg6[%c0_87, %c0_88] : memref<40x128xf32, #tpu.memory_space<vmem>>, vector<40x128xf32>
      tpu.vector_store %arg6[%c0_87, %c0_88], %225 {strides = array<i32>} : memref<40x128xf32, #tpu.memory_space<vmem>>, vector<40x128xf32>,
    } else {
    }
    %cst = arith.constant 0.000000e+00 : f32
    %3 = vector.broadcast %cst : f32 to vector<8x128xf32>
    %cst_1 = arith.constant 0.000000e+00 : f32
    %4 = vector.broadcast %cst_1 : f32 to vector<8x128xf32>
    %cst_2 = arith.constant 0.000000e+00 : f32
    %5 = vector.broadcast %cst_2 : f32 to vector<8x128xf32>
    %cst_3 = arith.constant 0.000000e+00 : f32
    %6 = vector.broadcast %cst_3 : f32 to vector<8x128xf32>
    %cst_4 = arith.constant 0.000000e+00 : f32
    %7 = vector.broadcast %cst_4 : f32 to vector<8x128xf32>
    %c0 = arith.constant 0 : index
    %c0_5 = arith.constant 0 : index
    %8 = vector.load %arg2[%c0, %c0_5] : memref<16x128xf32, #tpu.memory_space<vmem>>, vector<16x128xf32>
    %c0_6 = arith.constant 0 : index
    %c0_7 = arith.constant 0 : index
    %9 = vector.load %arg3[%c0_6, %c0_7] : memref<16x128xf32, #tpu.memory_space<vmem>>, vector<16x128xf32>
    %c0_8 = arith.constant 0 : index
    %c0_9 = arith.constant 0 : index
    %10 = vector.load %arg4[%c0_8, %c0_9] : memref<16x128xf32, #tpu.memory_space<vmem>>, vector<16x128xf32>
    %c0_10 = arith.constant 0 : index
    %c0_11 = arith.constant 0 : index
    %11 = vector.load %arg5[%c0_10, %c0_11] : memref<16x128xf32, #tpu.memory_space<vmem>>, vector<16x128xf32>
    %cst_12 = arith.constant 1.000000e-07 : f32
    %12 = vector.broadcast %cst_12 : f32 to vector<16x128xf32>
    %13 = arith.maximumf %8, %12 : vector<16x128xf32>
    %cst_13 = arith.constant 1.000000e-07 : f32
    %14 = vector.broadcast %cst_13 : f32 to vector<16x128xf32>
    %15 = arith.maximumf %9, %14 : vector<16x128xf32>
    %16 = arith.addf %13, %15 : vector<16x128xf32>
    %cst_14 = arith.constant 6.000000e+00 : f32
    %17 = vector.broadcast %cst_14 : f32 to vector<16x128xf32>
    %18 = arith.addf %16, %17 : vector<16x128xf32>
    %cst_15 = arith.constant 1.500000e+01 : f32
    %19 = vector.broadcast %cst_15 : f32 to vector<16x128xf32>
    %20 = arith.addf %16, %19 : vector<16x128xf32>
    %21 = arith.mulf %20, %16 : vector<16x128xf32>
    %cst_16 = arith.constant 8.500000e+01 : f32
    %22 = vector.broadcast %cst_16 : f32 to vector<16x128xf32>
    %23 = arith.addf %21, %22 : vector<16x128xf32>
    %24 = arith.mulf %23, %16 : vector<16x128xf32>
    %cst_17 = arith.constant 2.250000e+02 : f32
    %25 = vector.broadcast %cst_17 : f32 to vector<16x128xf32>
    %26 = arith.addf %24, %25 : vector<16x128xf32>
    %27 = arith.mulf %26, %16 : vector<16x128xf32>
    %cst_18 = arith.constant 2.740000e+02 : f32
    %28 = vector.broadcast %cst_18 : f32 to vector<16x128xf32>
    %29 = arith.addf %27, %28 : vector<16x128xf32>
    %30 = arith.mulf %29, %16 : vector<16x128xf32>
    %cst_19 = arith.constant 1.200000e+02 : f32
    %31 = vector.broadcast %cst_19 : f32 to vector<16x128xf32>
    %32 = arith.addf %30, %31 : vector<16x128xf32>
    %33 = arith.mulf %32, %16 : vector<16x128xf32>
    %cst_20 = arith.constant 6.000000e+00 : f32
    %34 = vector.broadcast %cst_20 : f32 to vector<16x128xf32>
    %35 = arith.mulf %34, %16 : vector<16x128xf32>
    %cst_21 = arith.constant 7.500000e+01 : f32
    %36 = vector.broadcast %cst_21 : f32 to vector<16x128xf32>
    %37 = arith.addf %35, %36 : vector<16x128xf32>
    %38 = arith.mulf %37, %16 : vector<16x128xf32>
    %cst_22 = arith.constant 3.400000e+02 : f32
    %39 = vector.broadcast %cst_22 : f32 to vector<16x128xf32>
    %40 = arith.addf %38, %39 : vector<16x128xf32>
    %41 = arith.mulf %40, %16 : vector<16x128xf32>
    %cst_23 = arith.constant 6.750000e+02 : f32
    %42 = vector.broadcast %cst_23 : f32 to vector<16x128xf32>
    %43 = arith.addf %41, %42 : vector<16x128xf32>
    %44 = arith.mulf %43, %16 : vector<16x128xf32>
    %cst_24 = arith.constant 5.480000e+02 : f32
    %45 = vector.broadcast %cst_24 : f32 to vector<16x128xf32>
    %46 = arith.addf %44, %45 : vector<16x128xf32>
    %47 = arith.mulf %46, %16 : vector<16x128xf32>
    %cst_25 = arith.constant 1.200000e+02 : f32
    %48 = vector.broadcast %cst_25 : f32 to vector<16x128xf32>
    %49 = arith.addf %47, %48 : vector<16x128xf32>
    %50 = arith.mulf %49, %18 : vector<16x128xf32>
    %cst_26 = arith.constant 5.000000e-01 : f32
    %51 = vector.broadcast %cst_26 : f32 to vector<16x128xf32>
    %52 = arith.mulf %51, %33 : vector<16x128xf32>
    %53 = arith.addf %50, %52 : vector<16x128xf32>
    %54 = arith.mulf %33, %18 : vector<16x128xf32>
    %55 = tpu.reciprocal %54 {approx = true} : vector<16x128xf32> -> vector<16x128xf32>
    %56 = arith.mulf %54, %55 : vector<16x128xf32>
    %cst_27 = arith.constant 2.000000e+00 : f32
    %57 = vector.broadcast %cst_27 : f32 to vector<16x128xf32>
    %58 = arith.subf %57, %56 : vector<16x128xf32>
    %59 = arith.mulf %55, %58 : vector<16x128xf32>
    %60 = arith.mulf %53, %59 : vector<16x128xf32>
    %61 = tpu.reciprocal %18 {approx = true} : vector<16x128xf32> -> vector<16x128xf32>
    %62 = arith.mulf %61, %61 : vector<16x128xf32>
    %cst_28 = arith.constant 0.0039682542 : f32
    %63 = vector.broadcast %cst_28 : f32 to vector<16x128xf32>
    %64 = arith.mulf %62, %63 : vector<16x128xf32>
    %cst_29 = arith.constant 0.00833333377 : f32
    %65 = vector.broadcast %cst_29 : f32 to vector<16x128xf32>
    %66 = arith.subf %65, %64 : vector<16x128xf32>
    %67 = arith.mulf %62, %66 : vector<16x128xf32>
    %cst_30 = arith.constant 0.0833333358 : f32
    %68 = vector.broadcast %cst_30 : f32 to vector<16x128xf32>
    %69 = arith.subf %68, %67 : vector<16x128xf32>
    %70 = arith.mulf %62, %69 : vector<16x128xf32>
    %71 = math.log %18 : vector<16x128xf32>
    %72 = arith.subf %71, %60 : vector<16x128xf32>
    %73 = arith.subf %72, %70 : vector<16x128xf32>
    %cst_31 = arith.constant 6.000000e+00 : f32
    %74 = vector.broadcast %cst_31 : f32 to vector<16x128xf32>
    %75 = arith.addf %13, %74 : vector<16x128xf32>
    %cst_32 = arith.constant 1.500000e+01 : f32
    %76 = vector.broadcast %cst_32 : f32 to vector<16x128xf32>
    %77 = arith.addf %13, %76 : vector<16x128xf32>
    %78 = arith.mulf %77, %13 : vector<16x128xf32>
    %cst_33 = arith.constant 8.500000e+01 : f32
    %79 = vector.broadcast %cst_33 : f32 to vector<16x128xf32>
    %80 = arith.addf %78, %79 : vector<16x128xf32>
    %81 = arith.mulf %80, %13 : vector<16x128xf32>
    %cst_34 = arith.constant 2.250000e+02 : f32
    %82 = vector.broadcast %cst_34 : f32 to vector<16x128xf32>
    %83 = arith.addf %81, %82 : vector<16x128xf32>
    %84 = arith.mulf %83, %13 : vector<16x128xf32>
    %cst_35 = arith.constant 2.740000e+02 : f32
    %85 = vector.broadcast %cst_35 : f32 to vector<16x128xf32>
    %86 = arith.addf %84, %85 : vector<16x128xf32>
    %87 = arith.mulf %86, %13 : vector<16x128xf32>
    %cst_36 = arith.constant 1.200000e+02 : f32
    %88 = vector.broadcast %cst_36 : f32 to vector<16x128xf32>
    %89 = arith.addf %87, %88 : vector<16x128xf32>
    %90 = arith.mulf %89, %13 : vector<16x128xf32>
    %cst_37 = arith.constant 6.000000e+00 : f32
    %91 = vector.broadcast %cst_37 : f32 to vector<16x128xf32>
    %92 = arith.mulf %91, %13 : vector<16x128xf32>
    %cst_38 = arith.constant 7.500000e+01 : f32
    %93 = vector.broadcast %cst_38 : f32 to vector<16x128xf32>
    %94 = arith.addf %92, %93 : vector<16x128xf32>
    %95 = arith.mulf %94, %13 : vector<16x128xf32>
    %cst_39 = arith.constant 3.400000e+02 : f32
    %96 = vector.broadcast %cst_39 : f32 to vector<16x128xf32>
    %97 = arith.addf %95, %96 : vector<16x128xf32>
    %98 = arith.mulf %97, %13 : vector<16x128xf32>
    %cst_40 = arith.constant 6.750000e+02 : f32
    %99 = vector.broadcast %cst_40 : f32 to vector<16x128xf32>
    %100 = arith.addf %98, %99 : vector<16x128xf32>
    %101 = arith.mulf %100, %13 : vector<16x128xf32>
    %cst_41 = arith.constant 5.480000e+02 : f32
    %102 = vector.broadcast %cst_41 : f32 to vector<16x128xf32>
    %103 = arith.addf %101, %102 : vector<16x128xf32>
    %104 = arith.mulf %103, %13 : vector<16x128xf32>
    %cst_42 = arith.constant 1.200000e+02 : f32
    %105 = vector.broadcast %cst_42 : f32 to vector<16x128xf32>
    %106 = arith.addf %104, %105 : vector<16x128xf32>
    %107 = arith.mulf %106, %75 : vector<16x128xf32>
    %cst_43 = arith.constant 5.000000e-01 : f32
    %108 = vector.broadcast %cst_43 : f32 to vector<16x128xf32>
    %109 = arith.mulf %108, %90 : vector<16x128xf32>
    %110 = arith.addf %107, %109 : vector<16x128xf32>
    %111 = arith.mulf %90, %75 : vector<16x128xf32>
    %112 = tpu.reciprocal %111 {approx = true} : vector<16x128xf32> -> vector<16x128xf32>
    %113 = arith.mulf %111, %112 : vector<16x128xf32>
    %cst_44 = arith.constant 2.000000e+00 : f32
    %114 = vector.broadcast %cst_44 : f32 to vector<16x128xf32>
    %115 = arith.subf %114, %113 : vector<16x128xf32>
    %116 = arith.mulf %112, %115 : vector<16x128xf32>
    %117 = arith.mulf %110, %116 : vector<16x128xf32>
    %118 = tpu.reciprocal %75 {approx = true} : vector<16x128xf32> -> vector<16x128xf32>
    %119 = arith.mulf %118, %118 : vector<16x128xf32>
    %cst_45 = arith.constant 0.0039682542 : f32
    %120 = vector.broadcast %cst_45 : f32 to vector<16x128xf32>
    %121 = arith.mulf %119, %120 : vector<16x128xf32>
    %cst_46 = arith.constant 0.00833333377 : f32
    %122 = vector.broadcast %cst_46 : f32 to vector<16x128xf32>
    %123 = arith.subf %122, %121 : vector<16x128xf32>
    %124 = arith.mulf %119, %123 : vector<16x128xf32>
    %cst_47 = arith.constant 0.0833333358 : f32
    %125 = vector.broadcast %cst_47 : f32 to vector<16x128xf32>
    %126 = arith.subf %125, %124 : vector<16x128xf32>
    %127 = arith.mulf %119, %126 : vector<16x128xf32>
    %128 = math.log %75 : vector<16x128xf32>
    %129 = arith.subf %128, %117 : vector<16x128xf32>
    %130 = arith.subf %129, %127 : vector<16x128xf32>
    %131 = arith.subf %130, %73 : vector<16x128xf32>
    %cst_48 = arith.constant 6.000000e+00 : f32
    %132 = vector.broadcast %cst_48 : f32 to vector<16x128xf32>
    %133 = arith.addf %15, %132 : vector<16x128xf32>
    %cst_49 = arith.constant 1.500000e+01 : f32
    %134 = vector.broadcast %cst_49 : f32 to vector<16x128xf32>
    %135 = arith.addf %15, %134 : vector<16x128xf32>
    %136 = arith.mulf %135, %15 : vector<16x128xf32>
    %cst_50 = arith.constant 8.500000e+01 : f32
    %137 = vector.broadcast %cst_50 : f32 to vector<16x128xf32>
    %138 = arith.addf %136, %137 : vector<16x128xf32>
    %139 = arith.mulf %138, %15 : vector<16x128xf32>
    %cst_51 = arith.constant 2.250000e+02 : f32
    %140 = vector.broadcast %cst_51 : f32 to vector<16x128xf32>
    %141 = arith.addf %139, %140 : vector<16x128xf32>
    %142 = arith.mulf %141, %15 : vector<16x128xf32>
    %cst_52 = arith.constant 2.740000e+02 : f32
    %143 = vector.broadcast %cst_52 : f32 to vector<16x128xf32>
    %144 = arith.addf %142, %143 : vector<16x128xf32>
    %145 = arith.mulf %144, %15 : vector<16x128xf32>
    %cst_53 = arith.constant 1.200000e+02 : f32
    %146 = vector.broadcast %cst_53 : f32 to vector<16x128xf32>
    %147 = arith.addf %145, %146 : vector<16x128xf32>
    %148 = arith.mulf %147, %15 : vector<16x128xf32>
    %cst_54 = arith.constant 6.000000e+00 : f32
    %149 = vector.broadcast %cst_54 : f32 to vector<16x128xf32>
    %150 = arith.mulf %149, %15 : vector<16x128xf32>
    %cst_55 = arith.constant 7.500000e+01 : f32
    %151 = vector.broadcast %cst_55 : f32 to vector<16x128xf32>
    %152 = arith.addf %150, %151 : vector<16x128xf32>
    %153 = arith.mulf %152, %15 : vector<16x128xf32>
    %cst_56 = arith.constant 3.400000e+02 : f32
    %154 = vector.broadcast %cst_56 : f32 to vector<16x128xf32>
    %155 = arith.addf %153, %154 : vector<16x128xf32>
    %156 = arith.mulf %155, %15 : vector<16x128xf32>
    %cst_57 = arith.constant 6.750000e+02 : f32
    %157 = vector.broadcast %cst_57 : f32 to vector<16x128xf32>
    %158 = arith.addf %156, %157 : vector<16x128xf32>
    %159 = arith.mulf %158, %15 : vector<16x128xf32>
    %cst_58 = arith.constant 5.480000e+02 : f32
    %160 = vector.broadcast %cst_58 : f32 to vector<16x128xf32>
    %161 = arith.addf %159, %160 : vector<16x128xf32>
    %162 = arith.mulf %161, %15 : vector<16x128xf32>
    %cst_59 = arith.constant 1.200000e+02 : f32
    %163 = vector.broadcast %cst_59 : f32 to vector<16x128xf32>
    %164 = arith.addf %162, %163 : vector<16x128xf32>
    %165 = arith.mulf %164, %133 : vector<16x128xf32>
    %cst_60 = arith.constant 5.000000e-01 : f32
    %166 = vector.broadcast %cst_60 : f32 to vector<16x128xf32>
    %167 = arith.mulf %166, %148 : vector<16x128xf32>
    %168 = arith.addf %165, %167 : vector<16x128xf32>
    %169 = arith.mulf %148, %133 : vector<16x128xf32>
    %170 = tpu.reciprocal %169 {approx = true} : vector<16x128xf32> -> vector<16x128xf32>
    %171 = arith.mulf %169, %170 : vector<16x128xf32>
    %cst_61 = arith.constant 2.000000e+00 : f32
    %172 = vector.broadcast %cst_61 : f32 to vector<16x128xf32>
    %173 = arith.subf %172, %171 : vector<16x128xf32>
    %174 = arith.mulf %170, %173 : vector<16x128xf32>
    %175 = arith.mulf %168, %174 : vector<16x128xf32>
    %176 = tpu.reciprocal %133 {approx = true} : vector<16x128xf32> -> vector<16x128xf32>
    %177 = arith.mulf %176, %176 : vector<16x128xf32>
    %cst_62 = arith.constant 0.0039682542 : f32
    %178 = vector.broadcast %cst_62 : f32 to vector<16x128xf32>
    %179 = arith.mulf %177, %178 : vector<16x128xf32>
    %cst_63 = arith.constant 0.00833333377 : f32
    %180 = vector.broadcast %cst_63 : f32 to vector<16x128xf32>
    %181 = arith.subf %180, %179 : vector<16x128xf32>
    %182 = arith.mulf %177, %181 : vector<16x128xf32>
    %cst_64 = arith.constant 0.0833333358 : f32
    %183 = vector.broadcast %cst_64 : f32 to vector<16x128xf32>
    %184 = arith.subf %183, %182 : vector<16x128xf32>
    %185 = arith.mulf %177, %184 : vector<16x128xf32>
    %186 = math.log %133 : vector<16x128xf32>
    %187 = arith.subf %186, %175 : vector<16x128xf32>
    %188 = arith.subf %187, %185 : vector<16x128xf32>
    %189 = arith.subf %188, %73 : vector<16x128xf32>
    %190 = arith.mulf %11, %10 : vector<16x128xf32>
    %191 = arith.subf %11, %190 : vector<16x128xf32>
    %192 = vector.shape_cast %190 : vector<16x128xf32> to vector<2x8x128xf32>
    %cst_65 = arith.constant dense<0.000000e+00> : vector<8x128xf32>
    %193 = vector.multi_reduction <add>, %192, %cst_65 [0] : vector<2x8x128xf32> to vector<8x128xf32>
    %194 = vector.shape_cast %191 : vector<16x128xf32> to vector<2x8x128xf32>
    %cst_66 = arith.constant dense<0.000000e+00> : vector<8x128xf32>
    %195 = vector.multi_reduction <add>, %194, %cst_66 [0] : vector<2x8x128xf32> to vector<8x128xf32>
    %196 = arith.mulf %131, %190 : vector<16x128xf32>
    %197 = vector.shape_cast %196 : vector<16x128xf32> to vector<2x8x128xf32>
    %cst_67 = arith.constant dense<0.000000e+00> : vector<8x128xf32>
    %198 = vector.multi_reduction <add>, %197, %cst_67 [0] : vector<2x8x128xf32> to vector<8x128xf32>
    %199 = arith.mulf %189, %190 : vector<16x128xf32>
    %200 = vector.shape_cast %199 : vector<16x128xf32> to vector<2x8x128xf32>
    %cst_68 = arith.constant dense<0.000000e+00> : vector<8x128xf32>
    %201 = vector.multi_reduction <add>, %200, %cst_68 [0] : vector<2x8x128xf32> to vector<8x128xf32>
    %202 = arith.mulf %189, %191 : vector<16x128xf32>
    %203 = vector.shape_cast %202 : vector<16x128xf32> to vector<2x8x128xf32>
    %cst_69 = arith.constant dense<0.000000e+00> : vector<8x128xf32>
    %204 = vector.multi_reduction <add>, %203, %cst_69 [0] : vector<2x8x128xf32> to vector<8x128xf32>
    %205 = arith.addf %3, %193 : vector<8x128xf32>
    %206 = arith.addf %4, %195 : vector<8x128xf32>
    %207 = arith.addf %5, %198 : vector<8x128xf32>
    %208 = arith.addf %6, %201 : vector<8x128xf32>
    %209 = arith.addf %7, %204 : vector<8x128xf32>
    %c0_70 = arith.constant 0 : index
    %c0_71 = arith.constant 0 : index
    %210 = vector.load %arg6[%c0_70, %c0_71] : memref<40x128xf32, #tpu.memory_space<vmem>>, vector<8x128xf32>
    %211 = arith.addf %210, %205 : vector<8x128xf32>
    %c0_72 = arith.constant 0 : index
    %c0_73 = arith.constant 0 : index
    %212 = vector.load %arg6[%c0_72, %c0_73] : memref<40x128xf32, #tpu.memory_space<vmem>>, vector<8x128xf32>
    tpu.vector_store %arg6[%c0_72, %c0_73], %211 {strides = array<i32>} : memref<40x128xf32, #tpu.memory_space<vmem>>, vector<8x128xf32>,
    %c8 = arith.constant 8 : index
    %c0_74 = arith.constant 0 : index
    %213 = vector.load %arg6[%c8, %c0_74] : memref<40x128xf32, #tpu.memory_space<vmem>>, vector<8x128xf32>
    %214 = arith.addf %213, %206 : vector<8x128xf32>
    %c8_75 = arith.constant 8 : index
    %c0_76 = arith.constant 0 : index
    %215 = vector.load %arg6[%c8_75, %c0_76] : memref<40x128xf32, #tpu.memory_space<vmem>>, vector<8x128xf32>
    tpu.vector_store %arg6[%c8_75, %c0_76], %214 {strides = array<i32>} : memref<40x128xf32, #tpu.memory_space<vmem>>, vector<8x128xf32>,
    %c16 = arith.constant 16 : index
    %c0_77 = arith.constant 0 : index
    %216 = vector.load %arg6[%c16, %c0_77] : memref<40x128xf32, #tpu.memory_space<vmem>>, vector<8x128xf32>
    %217 = arith.addf %216, %207 : vector<8x128xf32>
    %c16_78 = arith.constant 16 : index
    %c0_79 = arith.constant 0 : index
    %218 = vector.load %arg6[%c16_78, %c0_79] : memref<40x128xf32, #tpu.memory_space<vmem>>, vector<8x128xf32>
    tpu.vector_store %arg6[%c16_78, %c0_79], %217 {strides = array<i32>} : memref<40x128xf32, #tpu.memory_space<vmem>>, vector<8x128xf32>,
    %c24 = arith.constant 24 : index
    %c0_80 = arith.constant 0 : index
    %219 = vector.load %arg6[%c24, %c0_80] : memref<40x128xf32, #tpu.memory_space<vmem>>, vector<8x128xf32>
    %220 = arith.addf %219, %208 : vector<8x128xf32>
    %c24_81 = arith.constant 24 : index
    %c0_82 = arith.constant 0 : index
    %221 = vector.load %arg6[%c24_81, %c0_82] : memref<40x128xf32, #tpu.memory_space<vmem>>, vector<8x128xf32>
    tpu.vector_store %arg6[%c24_81, %c0_82], %220 {strides = array<i32>} : memref<40x128xf32, #tpu.memory_space<vmem>>, vector<8x128xf32>,
    %c32 = arith.constant 32 : index
    %c0_83 = arith.constant 0 : index
    %222 = vector.load %arg6[%c32, %c0_83] : memref<40x128xf32, #tpu.memory_space<vmem>>, vector<8x128xf32>
    %223 = arith.addf %222, %209 : vector<8x128xf32>
    %c32_84 = arith.constant 32 : index
    %c0_85 = arith.constant 0 : index
    %224 = vector.load %arg6[%c32_84, %c0_85] : memref<40x128xf32, #tpu.memory_space<vmem>>, vector<8x128xf32>
    tpu.vector_store %arg6[%c32_84, %c0_85], %223 {strides = array<i32>} : memref<40x128xf32, #tpu.memory_space<vmem>>, vector<8x128xf32>,
    return
  }
  func.func @transform_0(%arg0: i32, %arg1: i32) -> (i32, i32) {
    %c1_i32 = arith.constant 1 : i32
    %0 = arith.muli %arg0, %c1_i32 : i32
    %1 = arith.addi %0, %arg1 : i32
    %c0_i32 = arith.constant 0 : i32
    %2 = arith.minsi %1, %c0_i32 : i32
    %c0_i32_0 = arith.constant 0 : i32
    %c0_i32_1 = arith.constant 0 : i32
    return %2, %c0_i32_0 : i32, i32
  }
  func.func @transform_1(%arg0: i32, %arg1: i32) -> (i32, i32) {
    %c1_i32 = arith.constant 1 : i32
    %0 = arith.muli %arg0, %c1_i32 : i32
    %1 = arith.addi %0, %arg1 : i32
    %c0_i32 = arith.constant 0 : i32
    %2 = arith.minsi %1, %c0_i32 : i32
    %c0_i32_0 = arith.constant 0 : i32
    %c0_i32_1 = arith.constant 0 : i32
    return %2, %c0_i32_0 : i32, i32
  }
  func.func @transform_2(%arg0: i32, %arg1: i32) -> (i32, i32) {
    %c1_i32 = arith.constant 1 : i32
    %0 = arith.muli %arg0, %c1_i32 : i32
    %1 = arith.addi %0, %arg1 : i32
    %c0_i32 = arith.constant 0 : i32
    %2 = arith.minsi %1, %c0_i32 : i32
    %c0_i32_0 = arith.constant 0 : i32
    %c0_i32_1 = arith.constant 0 : i32
    return %2, %c0_i32_0 : i32, i32
  }
  func.func @transform_3(%arg0: i32, %arg1: i32) -> (i32, i32) {
    %c1_i32 = arith.constant 1 : i32
    %0 = arith.muli %arg0, %c1_i32 : i32
    %1 = arith.addi %0, %arg1 : i32
    %c0_i32 = arith.constant 0 : i32
    %2 = arith.minsi %1, %c0_i32 : i32
    %c0_i32_0 = arith.constant 0 : i32
    %c0_i32_1 = arith.constant 0 : i32
    return %2, %c0_i32_0 : i32, i32
  }
  func.func @transform_4(%arg0: i32, %arg1: i32) -> (i32, i32) {
    %c0_i32 = arith.constant 0 : i32
    %c0_i32_0 = arith.constant 0 : i32
    return %arg0, %c0_i32 : i32, i32
  }
}

</mosaic_0001>

<bundles_post_ra>
// kernel: tpu_custom_call.1
= control target key start
LH: loop header
LB: loop body
LE: loop exit
PB: predicated region body
PF: predicated region fallthrough
CT: control target
= control target key end

     0   :  { %9 = vsyncpa [#allocation3], 0  ;;  %s897_s0 = inlined_call_operand.hbm [shape: f32[16,128], index: 0, kind: input, shape index: {}]   ;;  %s898_s1 = inlined_call_operand.hbm [shape: f32[16,128], index: 1, kind: input, shape index: {}]   ;;  %s899_s2 = inlined_call_operand.hbm [shape: f32[16,128], index: 2, kind: input, shape index: {}]   ;;  %s900_s3 = inlined_call_operand.hbm [shape: f32[16,128], index: 3, kind: input, shape index: {}]   ;;  %s901_s4 = inlined_call_operand.hbm [shape: f32[40,128], index: 4, kind: output, shape index: {}]  }
   0x1   :  { %10 = vsyncpa [#allocation6], 0 }
   0x2   :  { %11 = vsyncpa [#allocation9], 0 }
   0x3   :  { %12 = vsyncpa [#allocation4], 0  ;;  %s610_s15 = smov [#allocation5]   ;;  %s611_s17 = smov [#allocation2]  }
   0x4   :  { %s42_s16 = sshll.u32 %s610_s15, 4  ;;  %s24_s18 = sshll.u32 %s611_s17, 4  ;;  %s43_s16 = int_to_ptr.vmem [resolvable:$true] %s42_s16  ;;  %s642_s18 = int_to_ptr.vmem [resolvable:$true] %s24_s18 }
   0x5   :  { %s492_s21 = scalar_lea.hbm %s898_s1, 256 }
   0x6   :  { %p493_p0 = scmp.ne.s32.totalorder %s898_s1, %s492_s21  ;;  %p496_p1 = scmp.lt.u32.totalorder %s492_s21, %s898_s1 }
   0x8   :  { %p498_p2 = pnand %p496_p1, %p493_p0 }
   0xa   :  { %501 = shalt.err (!%p498_p2)
}
   0xb   :  { %s502_s26 = scalar_lea.vmem %s43_s16, 256  ;;  %p507_p4 = scmp.lt.s32.totalorder %s43_s16, %s43_s16 }
   0xc   :  { %p503_p3 = scmp.ne.s32.totalorder %s43_s16, %s502_s26  ;;  %p508_p5 = scmp.lt.s32.totalorder %s502_s26, %s502_s26 }
   0xe   :  { %p509_p6 = por %p508_p5, %p507_p4 }
  0x10   :  { %p510_p7 = pnand %p509_p6, %p503_p3 }
  0x12   :  { %513 = shalt.err (!%p510_p7)
}
  0x13   :  { %s612_s27 = smov 128   ;;  %s613_s28 = smov 8  }
  0x14   :  { %48 = dma.hbm_to_vmem [thread:$0]  %s898_s1, 256, %s43_s16, [#allocation6], %s612_s27, %s612_s27, %s613_s28  }
  0x15   :  { %s514_s7 = scalar_lea.hbm %s897_s0, 256 }
  0x16   :  { %p515_p8 = scmp.ne.s32.totalorder %s897_s0, %s514_s7  ;;  %p518_p9 = scmp.lt.u32.totalorder %s514_s7, %s897_s0 }
  0x18   :  { %p520_p10 = pnand %p518_p9, %p515_p8 }
  0x1a   :  { %523 = shalt.err (!%p520_p10)
}
  0x1b   :  { %s524_s12 = scalar_lea.vmem %s642_s18, 256  ;;  %p529_p12 = scmp.lt.s32.totalorder %s642_s18, %s642_s18 }
  0x1c   :  { %p525_p11 = scmp.ne.s32.totalorder %s642_s18, %s524_s12  ;;  %p530_p13 = scmp.lt.s32.totalorder %s524_s12, %s524_s12 }
  0x1e   :  { %p531_p0 = por %p530_p13, %p529_p12 }
  0x20   :  { %p532_p1 = pnand %p531_p0, %p525_p11 }
  0x22   :  { %535 = shalt.err (!%p532_p1)
}
  0x23   :  { %30 = dma.hbm_to_vmem [thread:$0]  %s897_s0, 256, %s642_s18, [#allocation3], %s612_s27, %s612_s27, %s613_s28  }
  0x24   :  { %s614_s14 = smov [#allocation7]   ;;  %s615_s16 = smov [#allocation8]  }
  0x25   :  { %s60_s15 = sshll.u32 %s614_s14, 4  ;;  %s78_s17 = sshll.u32 %s615_s16, 4  ;;  %s61_s15 = int_to_ptr.vmem [resolvable:$true] %s60_s15  ;;  %s679_s17 = int_to_ptr.vmem [resolvable:$true] %s78_s17 }
  0x26   :  { %s536_s21 = scalar_lea.hbm %s899_s2, 256 }
  0x27   :  { %p537_p2 = scmp.ne.s32.totalorder %s899_s2, %s536_s21  ;;  %p540_p3 = scmp.lt.u32.totalorder %s536_s21, %s899_s2 }
  0x29   :  { %p542_p4 = pnand %p540_p3, %p537_p2 }
  0x2b   :  { %545 = shalt.err (!%p542_p4)
}
  0x2c   :  { %s546_s0 = scalar_lea.vmem %s61_s15, 256  ;;  %p551_p6 = scmp.lt.s32.totalorder %s61_s15, %s61_s15 }
  0x2d   :  { %p547_p5 = scmp.ne.s32.totalorder %s61_s15, %s546_s0  ;;  %p552_p7 = scmp.lt.s32.totalorder %s546_s0, %s546_s0 }
  0x2f   :  { %p553_p8 = por %p552_p7, %p551_p6 }
  0x31   :  { %p554_p9 = pnand %p553_p8, %p547_p5 }
  0x33   :  { %557 = shalt.err (!%p554_p9)
}
  0x34   :  { %66 = dma.hbm_to_vmem [thread:$0]  %s899_s2, 256, %s61_s15, [#allocation6], %s612_s27, %s612_s27, %s613_s28  }
  0x35   :  { %s558_s5 = scalar_lea.hbm %s900_s3, 256 }
  0x36   :  { %p559_p10 = scmp.ne.s32.totalorder %s900_s3, %s558_s5  ;;  %p562_p11 = scmp.lt.u32.totalorder %s558_s5, %s900_s3 }
  0x38   :  { %p564_p12 = pnand %p562_p11, %p559_p10 }
  0x3a   :  { %567 = shalt.err (!%p564_p12)
}
  0x3b   :  { %s568_s10 = scalar_lea.vmem %s679_s17, 256  ;;  %p573_p0 = scmp.lt.s32.totalorder %s679_s17, %s679_s17 }
  0x3c   :  { %p569_p13 = scmp.ne.s32.totalorder %s679_s17, %s568_s10  ;;  %p574_p1 = scmp.lt.s32.totalorder %s568_s10, %s568_s10 }
  0x3e   :  { %p575_p2 = por %p574_p1, %p573_p0 }
  0x40   :  { %p576_p3 = pnand %p575_p2, %p569_p13 }
  0x42   :  { %579 = shalt.err (!%p576_p3)
}
  0x43   :  { %84 = dma.hbm_to_vmem [thread:$0]  %s900_s3, 256, %s679_s17, [#allocation9], %s612_s27, %s612_s27, %s613_s28  }
  0x44   :  { %602 = dma.done.wait [#allocation3], 256  }
  0x45   :  { %603 = vsyncadd [#allocation3], 4294967040 }
  0x46   :  { %604 = dma.done.wait [#allocation6], 512  }
  0x47   :  { %605 = vsyncadd [#allocation6], 4294966784 }
  0x48   :  { %606 = dma.done.wait [#allocation9], 256  }
  0x49   :  { %607 = vsyncadd [#allocation9], 4294967040  ;;  %v126_v0 = vld [vmem:[#allocation7] sm:$0xff]  ;;  %v127_v1 = vld [vmem:[#allocation7 + $0x8] sm:$0xff]  ;;  %s616_s3 = smov [#allocation10]  }
  0x4a   :  { %v128_v2 = vld [vmem:[#allocation8] sm:$0xff]  ;;  %v129_v3 = vld [vmem:[#allocation8 + $0x8] sm:$0xff]  ;;  %v122_v5 = vld [vmem:[#allocation2] sm:$0xff]  ;;  %s426_s12 = sshll.u32 %s616_s3, 4  ;;  %s427_s12 = int_to_ptr.vmem [resolvable:$true] %s426_s12 }
  0x4b   :  { %v716_v4 = vmul.f32 %v128_v2, %v126_v0  ;;  %v123_v6 = vld [vmem:[#allocation2 + $0x8] sm:$0xff]  ;;  %v718_v7 = vmul.f32 %v129_v3, %v127_v1  ;;  %v124_v8 = vld [vmem:[#allocation5] sm:$0xff]  ;;  %v125_v9 = vld [vmem:[#allocation5 + $0x8] sm:$0xff]  ;;  %v720_v10 = vmax.f32 %v122_v5, 1e-07  ;;  %s580_s1 = scalar_lea.vmem %s427_s12, 640  ;;  %p585_p5 = scmp.lt.s32.totalorder %s427_s12, %s427_s12 }
  0x4c   :  { %v722_v11 = vmax.f32 %v123_v6, 1e-07  ;;  %v724_v12 = vmax.f32 %v124_v8, 1e-07  ;;  %v726_v13 = vmax.f32 %v125_v9, 1e-07  ;;  %p581_p4 = scmp.ne.s32.totalorder %s427_s12, %s580_s1  ;;  %p586_p6 = scmp.lt.s32.totalorder %s580_s1, %s580_s1 }
  0x4d   :  { %v390_v14 = vadd.f32 %v718_v7, %v716_v4  ;;  %v731_v15 = vsub.f32 %v128_v2, %v716_v4  ;;  %v734_v16 = vsub.f32 %v129_v3, %v718_v7  ;;  %v737_v17 = vadd.f32 6.0, %v720_v10 }
  0x4e   :  { %v741_v18 = vadd.f32 %v724_v12, %v720_v10  ;;  %v745_v19 = vadd.f32 %v726_v13, %v722_v11  ;;  %v220_v20 = vadd.f32 15.0, %v720_v10  ;;  %v221_v21 = vadd.f32 15.0, %v722_v11  ;;  %p587_p7 = por %p586_p6, %p585_p5 }
  0x4f   :  { %v391_v22 = vadd.f32 %v734_v16, %v731_v15  ;;  %v240_v23 = vmul.f32 6.0, %v720_v10  ;;  %v241_v24 = vmul.f32 6.0, %v722_v11  ;;  %408 = vst [vmem:[#allocation10] sm:$0xff] %v390_v14  ;;  %v773_v43 = vadd.f32 6.0, %v722_v11 }
  0x50   :  { %v754_v25 = vadd.f32 6.0, %v741_v18  ;;  %v757_v26 = vadd.f32 6.0, %v745_v19  ;;  %v138_v27 = vadd.f32 15.0, %v741_v18  ;;  %v139_v28 = vadd.f32 15.0, %v745_v19  ;;  %p588_p8 = pnand %p587_p7, %p581_p4 }
  0x51   :  { %v158_v29 = vmul.f32 6.0, %v741_v18  ;;  %v159_v30 = vmul.f32 6.0, %v745_v19  ;;  %v222_v31 = vmul.f32 %v220_v20, %v720_v10  ;;  %v223_v34 = vmul.f32 %v221_v21, %v722_v11  ;;  %411 = vst [vmem:[#allocation10 + $0x8] sm:$0xff] %v391_v22 }
  0x52   :  { %v140_v32 = vmul.f32 %v138_v27, %v741_v18  ;;  %v141_v33 = vmul.f32 %v139_v28, %v745_v19  ;;  %456 = vrcp.f32 %v754_v25  ;;  %v242_v48 = vadd.f32 75.0, %v240_v23 }
  0x53   :  { %v160_v35 = vadd.f32 75.0, %v158_v29  ;;  %v161_v36 = vadd.f32 75.0, %v159_v30  ;;  %458 = vrcp.f32 %v757_v26  ;;  %v224_v37 = vadd.f32 85.0, %v222_v31 }
  0x54   :  { %v142_v38 = vadd.f32 85.0, %v140_v32  ;;  %v143_v39 = vadd.f32 85.0, %v141_v33  ;;  %460 = vlog2.f32 %v754_v25  ;;  %v225_v40 = vadd.f32 85.0, %v223_v34 }
  0x55   :  { %v162_v41 = vmul.f32 %v160_v35, %v741_v18  ;;  %v163_v42 = vmul.f32 %v161_v36, %v745_v19  ;;  %v226_v44 = vmul.f32 %v224_v37, %v720_v10  ;;  %v243_v52 = vadd.f32 75.0, %v241_v24 }
  0x56   :  { %v144_v45 = vmul.f32 %v142_v38, %v741_v18  ;;  %v145_v46 = vmul.f32 %v143_v39, %v745_v19  ;;  %v227_v47 = vmul.f32 %v225_v40, %v722_v11  ;;  %v244_v56 = vmul.f32 %v242_v48, %v720_v10 }
  0x57   :  { %v164_v49 = vadd.f32 340.0, %v162_v41  ;;  %v165_v50 = vadd.f32 340.0, %v163_v42  ;;  %v228_v51 = vadd.f32 225.0, %v226_v44  ;;  %v245_v60 = vmul.f32 %v243_v52, %v722_v11 }
  0x58   :  { %v146_v53 = vadd.f32 225.0, %v144_v45  ;;  %v147_v54 = vadd.f32 225.0, %v145_v46  ;;  %v229_v55 = vadd.f32 225.0, %v227_v47  ;;  %462 = vlog2.f32 %v757_v26 }
  0x59   :  { %v166_v57 = vmul.f32 %v164_v49, %v741_v18  ;;  %v167_v58 = vmul.f32 %v165_v50, %v745_v19  ;;  %v230_v59 = vmul.f32 %v228_v51, %v720_v10  ;;  %v246_v3 = vadd.f32 340.0, %v244_v56 }
  0x5a   :  { %v148_v61 = vmul.f32 %v146_v53, %v741_v18  ;;  %v149_v62 = vmul.f32 %v147_v54, %v745_v19  ;;  %v231_v63 = vmul.f32 %v229_v55, %v722_v11  ;;  %v247_v14 = vadd.f32 340.0, %v245_v60 }
  0x5b   :  { %v168_v0 = vadd.f32 675.0, %v166_v57  ;;  %v169_v1 = vadd.f32 675.0, %v167_v58  ;;  %v232_v2 = vadd.f32 274.0, %v230_v59  ;;  %v248_v35 = vmul.f32 %v246_v3, %v720_v10 }
  0x5c   :  { %v457_v5 = vpop.eup %456  ;;  %v150_v6 = vadd.f32 274.0, %v148_v61  ;;  %v151_v8 = vadd.f32 274.0, %v149_v62  ;;  %v233_v9 = vadd.f32 274.0, %v231_v63  ;;  %v249_v61 = vmul.f32 %v247_v14, %v722_v11 }
  0x5d   :  { %v459_v20 = vpop.eup %458  ;;  %v170_v21 = vmul.f32 %v168_v0, %v741_v18  ;;  %v171_v22 = vmul.f32 %v169_v1, %v745_v19  ;;  %v198_v23 = vmul.f32 %v457_v5, %v457_v5  ;;  %v234_v24 = vmul.f32 %v232_v2, %v720_v10 }
  0x5e   :  { %v461_v27 = vpop.eup %460  ;;  %v152_v28 = vmul.f32 %v150_v6, %v741_v18  ;;  %v153_v29 = vmul.f32 %v151_v8, %v745_v19  ;;  %v199_v30 = vmul.f32 %v459_v20, %v459_v20  ;;  %v235_v31 = vmul.f32 %v233_v9, %v722_v11 }
  0x5f   :  { %v172_v32 = vadd.f32 548.0, %v170_v21  ;;  %v173_v33 = vadd.f32 548.0, %v171_v22  ;;  %v200_v34 = vmul.f32 0.003968254, %v198_v23  ;;  %v795_v39 = vmul.f32 0.6931472, %v461_v27 }
  0x60   :  { %v154_v36 = vadd.f32 120.0, %v152_v28  ;;  %v155_v37 = vadd.f32 120.0, %v153_v29  ;;  %v201_v38 = vmul.f32 0.003968254, %v199_v30  ;;  %v236_v44 = vadd.f32 120.0, %v234_v24 }
  0x61   :  { %v174_v40 = vmul.f32 %v172_v32, %v741_v18  ;;  %v175_v41 = vmul.f32 %v173_v33, %v745_v19  ;;  %v202_v42 = vsub.f32 0.008333334, %v200_v34  ;;  %v237_v48 = vadd.f32 120.0, %v235_v31 }
  0x62   :  { %v156_v45 = vmul.f32 %v154_v36, %v741_v18  ;;  %v157_v46 = vmul.f32 %v155_v37, %v745_v19  ;;  %v203_v47 = vsub.f32 0.008333334, %v201_v38  ;;  %v238_v52 = vmul.f32 %v236_v44, %v720_v10  ;;  %v463_v53 = vpop.eup %462 }
  0x63   :  { %v176_v49 = vadd.f32 120.0, %v174_v40  ;;  %v177_v50 = vadd.f32 120.0, %v175_v41  ;;  %v204_v51 = vmul.f32 %v202_v42, %v198_v23  ;;  %v239_v60 = vmul.f32 %v237_v48, %v722_v11 }
  0x64   :  { %v180_v54 = vmul.f32 0.5, %v156_v45  ;;  %v181_v55 = vmul.f32 0.5, %v157_v46  ;;  %v184_v56 = vmul.f32 %v156_v45, %v754_v25  ;;  %v185_v57 = vmul.f32 %v157_v46, %v757_v26 }
  0x65   :  { %v178_v58 = vmul.f32 %v176_v49, %v754_v25  ;;  %v179_v18 = vmul.f32 %v177_v50, %v757_v26  ;;  %v205_v59 = vmul.f32 %v203_v47, %v199_v30  ;;  %v206_v19 = vsub.f32 0.083333336, %v204_v51 }
  0x66   :  { %464 = vrcp.f32 %v184_v56  ;;  %v250_v62 = vadd.f32 675.0, %v248_v35  ;;  %v810_v1 = vmul.f32 0.6931472, %v463_v53  ;;  %v251_v25 = vadd.f32 675.0, %v249_v61 }
  0x67   :  { %v808_v63 = vadd.f32 %v180_v54, %v178_v58  ;;  %466 = vrcp.f32 %v185_v57  ;;  %v207_v0 = vsub.f32 0.083333336, %v205_v59  ;;  %v812_v2 = vadd.f32 %v181_v55, %v179_v18 }
  0x68   :  { %v814_v3 = vmul.f32 %v206_v19, %v198_v23  ;;  %v252_v26 = vmul.f32 %v250_v62, %v720_v10  ;;  %v262_v6 = vmul.f32 0.5, %v238_v52  ;;  %v266_v8 = vmul.f32 %v238_v52, %v737_v17 }
  0x69   :  { %v817_v5 = vmul.f32 %v207_v0, %v199_v30  ;;  %v267_v9 = vmul.f32 %v239_v60, %v773_v43  ;;  %v253_v14 = vmul.f32 %v251_v25, %v722_v11  ;;  %v263_v21 = vmul.f32 0.5, %v239_v60 }
  0x6a   :  { %v254_v20 = vadd.f32 548.0, %v252_v26  ;;  %468 = vrcp.f32 %v737_v17  ;;  %v824_v22 = vadd.f32 6.0, %v724_v12  ;;  %v304_v23 = vadd.f32 15.0, %v724_v12 }
  0x6b   :  { %470 = vrcp.f32 %v266_v8  ;;  %v305_v24 = vadd.f32 15.0, %v726_v13  ;;  %v255_v27 = vadd.f32 548.0, %v253_v14  ;;  %v324_v29 = vmul.f32 6.0, %v724_v12 }
  0x6c   :  { %v256_v28 = vmul.f32 %v254_v20, %v720_v10  ;;  %472 = vrcp.f32 %v267_v9  ;;  %v306_v30 = vmul.f32 %v304_v23, %v724_v12  ;;  %v325_v32 = vmul.f32 6.0, %v726_v13 }
  0x6d   :  { %474 = vrcp.f32 %v773_v43  ;;  %v307_v31 = vmul.f32 %v305_v24, %v726_v13  ;;  %v257_v33 = vmul.f32 %v255_v27, %v722_v11  ;;  %v326_v35 = vadd.f32 75.0, %v324_v29 }
  0x6e   :  { %v258_v34 = vadd.f32 120.0, %v256_v28  ;;  %476 = vlog2.f32 %v737_v17  ;;  %v308_v10 = vadd.f32 85.0, %v306_v30  ;;  %v327_v37 = vadd.f32 75.0, %v325_v32 }
  0x6f   :  { %478 = vlog2.f32 %v773_v43  ;;  %v309_v36 = vadd.f32 85.0, %v307_v31  ;;  %v259_v40 = vadd.f32 120.0, %v257_v33  ;;  %v839_v42 = vadd.f32 6.0, %v726_v13 }
  0x70   :  { %v465_v38 = vpop.eup %464  ;;  %v260_v41 = vmul.f32 %v258_v34, %v737_v17  ;;  %v328_v44 = vmul.f32 %v326_v35, %v724_v12  ;;  %v310_v46 = vmul.f32 %v308_v10, %v724_v12  ;;  %v329_v48 = vmul.f32 %v327_v37, %v726_v13 }
  0x71   :  { %v467_v45 = vpop.eup %466  ;;  %v188_v11 = vmul.f32 %v465_v38, %v184_v56  ;;  %v311_v47 = vmul.f32 %v309_v36, %v726_v13  ;;  %v261_v50 = vmul.f32 %v259_v40, %v773_v43  ;;  %480 = vrcp.f32 %v824_v22 }
  0x72   :  { %v189_v49 = vmul.f32 %v467_v45, %v185_v57  ;;  %v330_v51 = vadd.f32 340.0, %v328_v44  ;;  %v312_v52 = vadd.f32 225.0, %v310_v46  ;;  %v331_v54 = vadd.f32 340.0, %v329_v48 }
  0x73   :  { %v190_v17 = vsub.f32 2.0, %v188_v11  ;;  %v313_v53 = vadd.f32 225.0, %v311_v47  ;;  %v264_v18 = vadd.f32 %v262_v6, %v260_v41  ;;  %v265_v56 = vadd.f32 %v263_v21, %v261_v50 }
  0x74   :  { %v469_v55 = vpop.eup %468  ;;  %v191_v58 = vsub.f32 2.0, %v189_v49  ;;  %v332_v59 = vmul.f32 %v330_v51, %v724_v12  ;;  %v314_v57 = vmul.f32 %v312_v52, %v724_v12  ;;  %v333_v26 = vmul.f32 %v331_v54, %v726_v13 }
  0x75   :  { %v471_v19 = vpop.eup %470  ;;  %v192_v60 = vmul.f32 %v465_v38, %v190_v17  ;;  %v280_v61 = vmul.f32 %v469_v55, %v469_v55  ;;  %v315_v43 = vmul.f32 %v313_v53, %v726_v13  ;;  %482 = vrcp.f32 %v839_v42 }
  0x76   :  { %v473_v62 = vpop.eup %472  ;;  %v193_v0 = vmul.f32 %v467_v45, %v191_v58  ;;  %v270_v25 = vmul.f32 %v471_v19, %v266_v8  ;;  %v316_v23 = vadd.f32 274.0, %v314_v57  ;;  %v334_v34 = vadd.f32 675.0, %v332_v59 }
  0x77   :  { %v475_v14 = vpop.eup %474  ;;  %v194_v6 = vmul.f32 %v192_v60, %v808_v63  ;;  %v271_v20 = vmul.f32 %v473_v62, %v267_v9  ;;  %v282_v21 = vmul.f32 0.003968254, %v280_v61  ;;  %v317_v30 = vadd.f32 274.0, %v315_v43 }
  0x78   :  { %v477_v24 = vpop.eup %476  ;;  %v195_v27 = vmul.f32 %v193_v0, %v812_v2  ;;  %v272_v28 = vsub.f32 2.0, %v270_v25  ;;  %v281_v29 = vmul.f32 %v475_v14, %v475_v14  ;;  %v318_v40 = vmul.f32 %v316_v23, %v724_v12 }
  0x79   :  { %v479_v31 = vpop.eup %478  ;;  %v214_v32 = vsub.f32 %v795_v39, %v194_v6  ;;  %v273_v8 = vsub.f32 2.0, %v271_v20  ;;  %v284_v33 = vsub.f32 0.008333334, %v282_v21  ;;  %v293_v63 = vmul.f32 0.6931472, %v477_v24 }
  0x7a   :  { %v215_v35 = vsub.f32 %v810_v1, %v195_v27  ;;  %v274_v10 = vmul.f32 %v471_v19, %v272_v28  ;;  %v283_v36 = vmul.f32 0.003968254, %v281_v29  ;;  %v295_v38 = vmul.f32 0.6931472, %v479_v31 }
  0x7b   :  { %v275_v9 = vmul.f32 %v473_v62, %v273_v8  ;;  %v286_v37 = vmul.f32 %v284_v33, %v280_v61  ;;  %v481_v2 = vpop.eup %480  ;;  %v858_v41 = vsub.f32 %v214_v32, %v814_v3  ;;  %v319_v39 = vmul.f32 %v317_v30, %v726_v13 }
  0x7c   :  { %v276_v44 = vmul.f32 %v274_v10, %v264_v18  ;;  %v285_v45 = vsub.f32 0.008333334, %v283_v36  ;;  %v320_v47 = vadd.f32 120.0, %v318_v40  ;;  %v335_v1 = vadd.f32 675.0, %v333_v26 }
  0x7d   :  { %v277_v11 = vmul.f32 %v275_v9, %v265_v56  ;;  %v288_v46 = vsub.f32 0.083333336, %v286_v37  ;;  %v321_v50 = vadd.f32 120.0, %v319_v39  ;;  %v336_v51 = vmul.f32 %v334_v34, %v724_v12 }
  0x7e   :  { %v287_v48 = vmul.f32 %v285_v45, %v281_v29  ;;  %v296_v49 = vsub.f32 %v293_v63, %v276_v44  ;;  %v322_v53 = vmul.f32 %v320_v47, %v724_v12  ;;  %v337_v3 = vmul.f32 %v335_v1, %v726_v13 }
  0x7f   :  { %v290_v17 = vmul.f32 %v288_v46, %v280_v61  ;;  %v297_v52 = vsub.f32 %v295_v38, %v277_v11  ;;  %v483_v54 = vpop.eup %482  ;;  %v323_v58 = vmul.f32 %v321_v50, %v726_v13  ;;  %v338_v18 = vadd.f32 548.0, %v336_v51 }
  0x80   :  { %v289_v55 = vsub.f32 0.083333336, %v287_v48  ;;  %v364_v56 = vmul.f32 %v481_v2, %v481_v2  ;;  %v339_v19 = vadd.f32 548.0, %v337_v3  ;;  %v350_v60 = vmul.f32 %v322_v53, %v824_v22 }
  0x81   :  { %v298_v59 = vsub.f32 %v296_v49, %v290_v17  ;;  %v217_v57 = vsub.f32 %v215_v35, %v817_v5  ;;  %v351_v61 = vmul.f32 %v323_v58, %v839_v42  ;;  %v365_v0 = vmul.f32 %v483_v54, %v483_v54 }
  0x82   :  { %v291_v43 = vmul.f32 %v289_v55, %v281_v29  ;;  %484 = vrcp.f32 %v350_v60  ;;  %v340_v26 = vmul.f32 %v338_v18, %v724_v12  ;;  %v366_v14 = vmul.f32 0.003968254, %v364_v56 }
  0x83   :  { %v300_v62 = vsub.f32 %v298_v59, %v858_v41  ;;  %486 = vrcp.f32 %v351_v61  ;;  %v341_v6 = vmul.f32 %v339_v19, %v726_v13  ;;  %v367_v20 = vmul.f32 0.003968254, %v365_v0 }
  0x84   :  { %v299_v25 = vsub.f32 %v297_v52, %v291_v43  ;;  %488 = vlog2.f32 %v824_v22  ;;  %v342_v24 = vadd.f32 120.0, %v340_v26  ;;  %v368_v27 = vsub.f32 0.008333334, %v366_v14 }
  0x85   :  { %v392_v5 = vmul.f32 %v716_v4, %v300_v62  ;;  %490 = vlog2.f32 %v839_v42  ;;  %v343_v28 = vadd.f32 120.0, %v341_v6  ;;  %v369_v29 = vsub.f32 0.008333334, %v367_v20 }
  0x86   :  { %v301_v21 = vsub.f32 %v299_v25, %v217_v57  ;;  %v344_v12 = vmul.f32 %v342_v24, %v824_v22  ;;  %v346_v31 = vmul.f32 0.5, %v322_v53  ;;  %v370_v32 = vmul.f32 %v368_v27, %v364_v56 }
  0x87   :  { %v345_v8 = vmul.f32 %v343_v28, %v839_v42  ;;  %v347_v33 = vmul.f32 0.5, %v323_v58  ;;  %v371_v34 = vmul.f32 %v369_v29, %v365_v0 }
  0x88   :  { %v393_v23 = vmul.f32 %v718_v7, %v301_v21  ;;  %v348_v37 = vadd.f32 %v346_v31, %v344_v12  ;;  %v372_v40 = vsub.f32 0.083333336, %v370_v32 }
  0x89   :  { %v349_v2 = vadd.f32 %v347_v33, %v345_v8  ;;  %v373_v45 = vsub.f32 0.083333336, %v371_v34 }
  0x8a   :  { %v394_v30 = vadd.f32 %v393_v23, %v392_v5  ;;  %v374_v42 = vmul.f32 %v372_v40, %v364_v56 }
  0x8b   :  { %v375_v48 = vmul.f32 %v373_v45, %v365_v0 }
  0x8c   :  { %v485_v13 = vpop.eup %484  ;;  %414 = vst [vmem:[#allocation10 + $0x10] sm:$0xff] %v394_v30 }
  0x8d   :  { %v487_v35 = vpop.eup %486  ;;  %v354_v10 = vmul.f32 %v485_v13, %v350_v60 }
  0x8e   :  { %v489_v36 = vpop.eup %488  ;;  %v355_v63 = vmul.f32 %v487_v35, %v351_v61 }
  0x8f   :  { %v491_v9 = vpop.eup %490  ;;  %v356_v38 = vsub.f32 2.0, %v354_v10  ;;  %v377_v39 = vmul.f32 0.6931472, %v489_v36 }
  0x90   :  { %v357_v44 = vsub.f32 2.0, %v355_v63  ;;  %v379_v46 = vmul.f32 0.6931472, %v491_v9 }
  0x91   :  { %v358_v22 = vmul.f32 %v485_v13, %v356_v38 }
  0x92   :  { %v359_v11 = vmul.f32 %v487_v35, %v357_v44 }
  0x93   :  { %v360_v47 = vmul.f32 %v358_v22, %v348_v37 }
  0x94   :  { %v361_v1 = vmul.f32 %v359_v11, %v349_v2 }
  0x95   :  { %v380_v49 = vsub.f32 %v377_v39, %v360_v47 }
  0x96   :  { %v381_v50 = vsub.f32 %v379_v46, %v361_v1 }
  0x97   :  { %v382_v51 = vsub.f32 %v380_v49, %v374_v42 }
  0x98   :  { %v383_v17 = vsub.f32 %v381_v50, %v375_v48 }
  0x99   :  { %v384_v52 = vsub.f32 %v382_v51, %v858_v41 }
  0x9a   :  { %v385_v53 = vsub.f32 %v383_v17, %v217_v57 }
  0x9b   :  { %v395_v3 = vmul.f32 %v716_v4, %v384_v52  ;;  %v398_v54 = vmul.f32 %v731_v15, %v384_v52 }
  0x9c   :  { %v396_v55 = vmul.f32 %v718_v7, %v385_v53  ;;  %v399_v58 = vmul.f32 %v734_v16, %v385_v53 }
  0x9e   :  { %v397_v18 = vadd.f32 %v396_v55, %v395_v3  ;;  %v400_v56 = vadd.f32 %v399_v58, %v398_v54 }
  0xa0   :  { %417 = vst [vmem:[#allocation10 + $0x18] sm:$0xff] %v397_v18  ;;  %420 = vst [vmem:[#allocation10 + $0x20] sm:$0xff] %v400_v56 }
  0xa1   :  { %591 = shalt.err (!%p588_p8)
}
  0xa2   :  { %s592_s15 = scalar_lea.hbm %s901_s4, 640 }
  0xa3   :  { %p593_p9 = scmp.ne.s32.totalorder %s901_s4, %s592_s15  ;;  %p596_p10 = scmp.lt.u32.totalorder %s592_s15, %s901_s4 }
  0xa5   :  { %p598_p11 = pnand %p596_p10, %p593_p9 }
  0xa7   :  { %601 = shalt.err (!%p598_p11)
}
  0xa8   :  { %432 = dma.vmem_to_hbm [thread:$0]  %s427_s12, 640, %s901_s4, [#allocation4], %s612_s27, %s612_s27, %s613_s28  }
  0xa9   :  { %608 = dma.done.wait [#allocation4], 640  }
  0xaa   :  { %609 = vsyncadd [#allocation4], 4294966656 }
  0xab   :  { %436 = vsyncpa [#allocation3], 1 }
  0xac   :  { %437 = vsyncpa [#allocation6], 1 }
  0xad   :  { %438 = vsyncpa [#allocation9], 1 }
  0xae   :  { %439 = vsyncpa [#allocation4], 1 }

</bundles_post_ra>
